<compile_context>
chip_gen: v7x
topology: tpu7x:2x2x1
jax: 0.10.0
libtpu: 0.0.40
codegen_flags: <defaults>
</compile_context>

<pallas_src>
import functools

import jax
import jax.numpy as jnp
from jax.experimental import pallas as pl
from jax.experimental.pallas import tpu as pltpu


def _biasfree_ln_kernel(x_ref, w_ref, o_ref):
    # x_ref: (1, C, TL) tile, w_ref: (C, 1) weight, o_ref: (1, C, TL)
    x = x_ref[...].astype(jnp.float32)                      # (1, C, TL)
    c = x.shape[1]
    inv_c = jnp.float32(1.0 / c)

    # One-pass (biased) variance over the channel/sublane axis:
    # two independent reductions (XLU) that can overlap with elementwise work.
    s1 = jnp.sum(x, axis=1, keepdims=True)                  # (1, 1, TL)
    s2 = jnp.sum(x * x, axis=1, keepdims=True)              # (1, 1, TL)
    mean = s1 * inv_c
    var = jnp.maximum(s2 * inv_c - mean * mean, 0.0)        # guard cancellation
    inv = jax.lax.rsqrt(var + 1e-5)                         # EUP slot

    w = w_ref[...].astype(jnp.float32)[None, :, :]          # (1, C, 1)
    o_ref[...] = (x * inv * w).astype(o_ref.dtype)


def _pick_lane_tile(length, c, itemsize, target_bytes=1 << 20):
    """Lane tile over the flattened spatial axis: multiple of 128 dividing `length`,
    sized so one input buffer is ~1 MiB (amortizes per-step overhead)."""
    if length % 128 != 0:
        # Full-extent block is always legal regardless of the (8,128) rule.
        return length
    target = max(128, (target_bytes // max(c * itemsize, 1)) // 128 * 128)
    tl = max(128, min(length, target) // 128 * 128)
    while length % tl != 0:        # terminates at 128 (128 | length)
        tl -= 128
    return tl


@functools.partial(jax.jit, static_argnames=("tl",))
def _biasfree_ln_call(x3d, w2d, *, tl):
    B, C, L = x3d.shape
    grid = (B, L // tl)
    return pl.pallas_call(
        _biasfree_ln_kernel,
        out_shape=jax.ShapeDtypeStruct((B, C, L), x3d.dtype),
        grid_spec=pltpu.PrefetchScalarGridSpec(
            num_scalar_prefetch=0,
            grid=grid,
            in_specs=[
                pl.BlockSpec((1, C, tl), lambda b, l: (b, 0, l)),  # x tile
                pl.BlockSpec((C, 1), lambda b, l: (0, 0)),         # weight
            ],
            out_specs=pl.BlockSpec((1, C, tl), lambda b, l: (b, 0, l)),
        ),
        compiler_params=pltpu.CompilerParams(
            dimension_semantics=("parallel", "parallel"),
            vmem_limit_bytes=32 * 1024 * 1024,   # headroom over v5e's 16 MiB default
        ),
    )(x3d, w2d)


def biasfree_layernorm_channels(x3d, weight):
    """x3d: (B, C, L); normalizes over C (BiasFree). weight: (C,)."""
    B, C, L = x3d.shape
    tl = _pick_lane_tile(L, C, jnp.dtype(x3d.dtype).itemsize)
    return _biasfree_ln_call(x3d, weight.reshape(C, 1), tl=tl)


def biasfree_layernorm_nchw(x_nchw, weight):
    """x_nchw: (B, C, H, W). Equivalent to: rearrange 'b c h w -> b (h w) c',
    BiasFree_LayerNorm(C), rearrange back — but with no transposes (pure reshape)."""
    B, C, H, W = x_nchw.shape
    x3d = x_nchw.reshape(B, C, H * W)          # free reshape, no data movement
    y3d = biasfree_layernorm_channels(x3d, weight)
    return y3d.reshape(B, C, H, W)


def _reference(x_nchw, weight):
    # pure-JAX reference of the PyTorch forward (applied over channels per pixel)
    x = jnp.transpose(x_nchw, (0, 2, 3, 1)).astype(jnp.float32)
    var = jnp.var(x, axis=-1, keepdims=True)   # biased (ddof=0)
    y = x / jnp.sqrt(var + 1e-5) * weight.astype(jnp.float32)
    return jnp.transpose(y, (0, 3, 1, 2)).astype(x_nchw.dtype)


if __name__ == "__main__":
    key = jax.random.PRNGKey(0)
    k_x, k_w = jax.random.split(key)
    B, C, H, W = 2, 32, 16, 16                 # normalized_shape = C = 32
    x = jax.random.normal(k_x, (B, C, H, W), dtype=jnp.float32)
    # module initializes weight to ones; use non-trivial values to exercise scaling
    weight = jax.random.uniform(k_w, (C,), dtype=jnp.float32, minval=0.5, maxval=1.5)

    out = biasfree_layernorm_nchw(x, weight)
    out = jax.block_until_ready(out)

    ref = _reference(x, weight)
    assert out.shape == x.shape and out.dtype == x.dtype
    assert jnp.allclose(out, ref, atol=1e-5, rtol=1e-5)
    print("KERNEL_OK")
</pallas_src>

<mosaic_0001>
module attributes {stable_mosaic.version = 11 : i64} {
  func.func @_biasfree_ln_kernel(%arg0: i32, %arg1: i32, %arg2: memref<1x32x256xf32, #tpu.memory_space<vmem>>, %arg3: memref<32x1xf32, #tpu.memory_space<vmem>>, %arg4: memref<1x32x256xf32, #tpu.memory_space<vmem>>) attributes {dimension_semantics = [#tpu.dimension_semantics<parallel>, #tpu.dimension_semantics<parallel>], iteration_bounds = array<i64: 2, 1>, scalar_prefetch = 0 : i64, scratch_operands = 0 : i64, tpu.core_type = #tpu.core_type<tc>, window_params = [{transform_indices = @transform_0, window_bounds = array<i64: 1, 32, 256>}, {pipeline_mode = #tpu.pipeline_mode<synchronous>, transform_indices = @transform_1, window_bounds = array<i64: 32, 1>}, {transform_indices = @transform_2, window_bounds = array<i64: 1, 32, 256>}]} {
    %c0 = arith.constant 0 : index
    %c0_0 = arith.constant 0 : index
    %c0_1 = arith.constant 0 : index
    %0 = vector.load %arg2[%c0, %c0_0, %c0_1] : memref<1x32x256xf32, #tpu.memory_space<vmem>>, vector<1x32x256xf32>
    %cst = arith.constant dense<0.000000e+00> : vector<1x256xf32>
    %1 = vector.multi_reduction <add>, %0, %cst [1] : vector<1x32x256xf32> to vector<1x256xf32>
    %2 = vector.shape_cast %1 : vector<1x256xf32> to vector<1x1x256xf32>
    %3 = arith.mulf %0, %0 : vector<1x32x256xf32>
    %cst_2 = arith.constant dense<0.000000e+00> : vector<1x256xf32>
    %4 = vector.multi_reduction <add>, %3, %cst_2 [1] : vector<1x32x256xf32> to vector<1x256xf32>
    %5 = vector.shape_cast %4 : vector<1x256xf32> to vector<1x1x256xf32>
    %cst_3 = arith.constant 3.125000e-02 : f32
    %6 = vector.broadcast %cst_3 : f32 to vector<1x1x256xf32>
    %7 = arith.mulf %2, %6 : vector<1x1x256xf32>
    %cst_4 = arith.constant 3.125000e-02 : f32
    %8 = vector.broadcast %cst_4 : f32 to vector<1x1x256xf32>
    %9 = arith.mulf %5, %8 : vector<1x1x256xf32>
    %10 = arith.mulf %7, %7 : vector<1x1x256xf32>
    %11 = arith.subf %9, %10 : vector<1x1x256xf32>
    %cst_5 = arith.constant 0.000000e+00 : f32
    %12 = vector.broadcast %cst_5 : f32 to vector<1x1x256xf32>
    %13 = arith.maximumf %11, %12 : vector<1x1x256xf32>
    %cst_6 = arith.constant 9.99999974E-6 : f32
    %14 = vector.broadcast %cst_6 : f32 to vector<1x1x256xf32>
    %15 = arith.addf %13, %14 : vector<1x1x256xf32>
    %16 = math.rsqrt %15 : vector<1x1x256xf32>
    %c0_7 = arith.constant 0 : index
    %c0_8 = arith.constant 0 : index
    %17 = vector.load %arg3[%c0_7, %c0_8] : memref<32x1xf32, #tpu.memory_space<vmem>>, vector<32x1xf32>
    %18 = vector.shape_cast %17 : vector<32x1xf32> to vector<1x32x1xf32>
    %19 = vector.broadcast %16 : vector<1x1x256xf32> to vector<1x32x256xf32>
    %20 = arith.mulf %0, %19 : vector<1x32x256xf32>
    %21 = vector.broadcast %18 : vector<1x32x1xf32> to vector<1x32x256xf32>
    %22 = arith.mulf %20, %21 : vector<1x32x256xf32>
    %c0_9 = arith.constant 0 : index
    %c0_10 = arith.constant 0 : index
    %c0_11 = arith.constant 0 : index
    %23 = vector.load %arg4[%c0_9, %c0_10, %c0_11] : memref<1x32x256xf32, #tpu.memory_space<vmem>>, vector<1x32x256xf32>
    tpu.vector_store %arg4[%c0_9, %c0_10, %c0_11], %22 {strides = array<i32>} : memref<1x32x256xf32, #tpu.memory_space<vmem>>, vector<1x32x256xf32>,
    return
  }
  func.func @transform_0(%arg0: i32, %arg1: i32) -> (i32, i32, i32) {
    %c0_i32 = arith.constant 0 : i32
    %c0_i32_0 = arith.constant 0 : i32
    return %arg0, %c0_i32, %arg1 : i32, i32, i32
  }
  func.func @transform_1(%arg0: i32, %arg1: i32) -> (i32, i32) {
    %c0_i32 = arith.constant 0 : i32
    %c0_i32_0 = arith.constant 0 : i32
    %c0_i32_1 = arith.constant 0 : i32
    return %c0_i32, %c0_i32_0 : i32, i32
  }
  func.func @transform_2(%arg0: i32, %arg1: i32) -> (i32, i32, i32) {
    %c0_i32 = arith.constant 0 : i32
    %c0_i32_0 = arith.constant 0 : i32
    return %arg0, %c0_i32, %arg1 : i32, i32, i32
  }
}

</mosaic_0001>

<bundles_post_ra>
// kernel: _biasfree_ln_call.1
= control target key start
LH: loop header
LB: loop body
LE: loop exit
PB: predicated region body
PF: predicated region fallthrough
CT: control target
= control target key end

     0   :  { %7 = vsyncpa [#allocation3], 0  ;;  %s850_s0 = inlined_call_operand.hbm [shape: f32[2,32,256], index: 0, kind: input, shape index: {}]   ;;  %s851_s1 = inlined_call_operand.vmem [shape: f32[32,1], index: 1, kind: input, shape index: {}]   ;;  %s852_s2 = inlined_call_operand.hbm [shape: f32[2,32,256], index: 2, kind: output, shape index: {}]  }
   0x1   :  { %9 = vsyncpa [#allocation3 + $0x1], 0 }
   0x2   :  { %10 = vsyncpa [#allocation4], 0 }
   0x3   :  { %12 = vsyncpa [#allocation4 + $0x1], 0  ;;  %s625_s9 = smov 0   ;;  %s627_s10 = smov 0  }
   0x4   :  { %s629_s11 = smov 0   ;;  %s631_s12 = smov 0  }
   0x5   :  { %s633_s13 = smov 0   ;;  %s635_s14 = smov 0  }
   0x6 LB: > { %s399_s15 = sadd.s32 4294967295, %s601_s14   ;;  %s400_s16 = sadd.s32 4294967294, %s601_s14   ;;  %s601_s14 = sphi %s635_s14, %s18_s14   ;;  %s597_s13 = sphi %s633_s13, %s867_s13   ;;  %s593_s12 = sphi %s631_s12, %s866_s12   ;;  %s589_s11 = sphi %s629_s11, %s865_s11   ;;  %s585_s10 = sphi %s627_s10, %s864_s10   ;;  %s581_s9 = sphi %s625_s9, %s863_s9  }
   0x7   : > { %s30_s17 = sadd.s32 1, %s597_s13  ;;  %s39_s18 = sadd.s32 1, %s589_s11 }
   0x8   : > { %p32_p0 = scmp.ge.s32.totalorder %s30_s17, 2  ;;  %p46_p1 = scmp.ne.s32.totalorder %s589_s11, %s585_s10 }
   0x9   : > { %p47_p2 = scmp.eq.s32.totalorder %s601_s14, 0  ;;  %p52_p3 = scmp.ne.s32.totalorder %s585_s10, %s581_s9 }
   0xa   : > { %s869_s17 = smov (%p32_p0, %s30_s17), 0  ;;  %p53_p5 = scmp.eq.s32.totalorder %s399_s15, 0 }
   0xb   : > { %p666_p4 = por %p47_p2, %p46_p1  ;;  %s34_s20 = ssub.s32 %s597_s13, %s869_s17 }
   0xc   : > { %p99_p6 = scmp.eq.s32.totalorder %s399_s15, 1  ;;  %p37_p7 = scmp.eq.s32.totalorder %s34_s20, 0 }
   0xd   : > { %p672_p8 = por %p53_p5, %p52_p3  ;;  %p105_p10 = scmp.eq.s32.totalorder %s400_s16, 1 }
   0xe   : > { %p676_p9 = por %p99_p6, %p46_p1  ;;  %p428_p13 = scmp.lt.s32.totalorder %s601_s14, 2 }
   0xf   : > { %s681_s23 = scalar_select %p37_p7, %s589_s11, %s39_s18  }
  0x10   : > { %s856_s22 = scalar_select %p676_p9, 1, 0 }
  0x11   : > { %p683_p11 = por %p105_p10, %p52_p3  ;;  %s128_s25 = sand.u32 1, %s589_s11  }
  0x12   : > { %s403_s26 = sshll.u32 %s128_s25, 6  ;;  %s414_s27 = sshll.u32 %s597_s13, 10 }
  0x13   : > { %s857_s24 = scalar_select %p683_p11, 1, 0 }
  0x14   : > { %s694_s30 = scalar_lea.hbm %s850_s0, %s414_s27  ;;  %s132_s3 = scalar_lea.vmem [#allocation2], %s403_s26 }
  0x15   : > { %s141_s4 = sshll.u32 %s132_s3, 4  ;;  %p700_p0 = pnand %p428_p13, %p666_p4  ;;  %s696_s4 = int_to_ptr.vmem [resolvable:$true] %s141_s4 }
  0x16   : > { %s705_s6 = scalar_lea.sflag [#allocation3], %s128_s25  ;;  %s489_s7 = scalar_lea.hbm %s694_s30, 1024 }
  0x17   : > { %p490_p2 = scmp.ne.s32.totalorder %s694_s30, %s489_s7  ;;  %p491_p3 = pneg %p700_p0 }
  0x18   : > { %s494_s16 = scalar_lea.hbm %s850_s0, 2048  ;;  %p495_p4 = scmp.lt.u32.totalorder %s694_s30, %s850_s0 }
  0x19   : > { %p492_p5 = pnand %p491_p3, %p490_p2  ;;  %p496_p7 = scmp.lt.u32.totalorder %s494_s16, %s489_s7 }
  0x1a   : > { %p498_p13 = scmp.lt.u32.totalorder %s489_s7, %s694_s30 }
  0x1b   : > { %p493_p6 = pneg %p492_p5  ;;  %p497_p10 = por %p496_p7, %p495_p4 }
  0x1d   : > { %p499_p12 = por %p498_p13, %p497_p10 }
  0x1f   : > { %p500_p1 = pnand %p499_p12, %p493_p6 }
  0x21   : > { %503 = shalt.err (!%p500_p1)
}
  0x22   : > { %s504_s20 = scalar_lea.vmem %s696_s4, 1024  ;;  %s603_s25 = smov [#allocation2]  }
  0x23   : > { %p505_p2 = scmp.ne.s32.totalorder %s696_s4, %s504_s20  ;;  %s509_s26 = sshll.u32 %s603_s25, 4  ;;  %s510_s26 = int_to_ptr.vmem [resolvable:$false] %s509_s26 }
  0x24   : > { %s511_s27 = scalar_lea.vmem %s510_s26, 2048  ;;  %p512_p9 = scmp.lt.s32.totalorder %s696_s4, %s510_s26 }
  0x25   : > { %p507_p5 = pnand %p505_p2, %p491_p3  ;;  %p513_p4 = scmp.lt.s32.totalorder %s511_s27, %s504_s20 }
  0x27   : > { %p508_p11 = pneg %p507_p5  ;;  %p514_p7 = por %p513_p4, %p512_p9 }
  0x29   : > { %p515_p10 = pnand %p514_p7, %p508_p11 }
  0x2b   : > { %518 = shalt.err (!%p515_p10)
}
  0x2c   : > { %s604_s28 = smov 256   ;;  %s605_s29 = smov 16  }
  0x2d   : > { %423 = dma.hbm_to_vmem [thread:$0]  (!%p700_p0), %s694_s30, 1024, %s696_s4, %s705_s6, %s604_s28, %s604_s28, %s605_s29  }
  0x2e   : > { %p149_p12 = scmp.lt.s32.totalorder %s601_s14, 3  ;;  %p859_p1 = scmp.ge.s32.totalorder %s601_s14, 1 }
  0x30   : > { %p150_p3 = pnand %p859_p1, %p149_p12 }
  0x31   : > { %s737_s3 = sand.u32 (!%p150_p3), 1, %s585_s10  }
  0x32   : > { %153 = sbr.rel (%p150_p3) target bundleno = 210 (0xd2), region = 28  ;;  %s407_s7 = sshll.u32 (!%p150_p3), %s737_s3, 6 }
  0x33   : > { %s156_s8 = scalar_lea.sflag (!%p150_p3), [#allocation3], %s737_s3  ;;  %s743_s15 = scalar_lea.vmem (!%p150_p3), [#allocation2], %s407_s7 }
  0x39   : > { %572 = dma.done.wait (%p672_p8), %s156_s8, 1024  }
  0x3a   : > { %574 = vsyncadd (%p672_p8), %s156_s8, 4294966272  ;;  %v606_v0 = vmov 0   ;;  %v250_v1 = vld [vmem:[%s851_s1 + $0x10] sm:$0xff]  ;;  %v248_v2 = vld [vmem:[%s851_s1] sm:$0xff]  ;;  %s179_s20 = scalar_lea.vmem [#allocation5], %s407_s7  ;;  %s415_s26 = sshll.u32 %s593_s12, 10 }
  0x3b   : > { %484 = vset.pattern.permute.xlu1 %v606_v0  ;;  %483 = vset.pattern.permute.xlu0 %v606_v0  ;;  %v251_v3 = vld [vmem:[%s851_s1 + $0x18] sm:$0xff]  ;;  %v249_v4 = vld [vmem:[%s851_s1 + $0x8] sm:$0xff]  ;;  %v762_v5 = vld [vmem:[%s743_s15] sm:$0xff]  ;;  %s312_s25 = sshll.u32 %s179_s20, 4  ;;  %s801_s29 = scalar_lea.hbm %s852_s2, %s415_s26  ;;  %s796_s25 = int_to_ptr.vmem [resolvable:$true] %s312_s25 }
  0x3c   : > { %272 = vperm.xlu1 %484, %v250_v1   ;;  %262 = vperm.xlu0 %483, %v248_v2   ;;  %v765_v6 = vld [vmem:[%s743_s15 + $0x10] sm:$0xff]  ;;  %v768_v7 = vld [vmem:[%s743_s15 + $0x8] sm:$0xff]  ;;  %v771_v8 = vld [vmem:[%s743_s15 + $0x18] sm:$0xff]  ;;  %v208_v10 = vmul.f32 %v762_v5, %v762_v5  ;;  %s297_s12 = scalar_lea.sflag [#allocation4], %s737_s3  ;;  %s519_s7 = scalar_lea.vmem %s796_s25, 1024 }
  0x3d   : > { %v190_v9 = vadd.f32 %v765_v6, %v762_v5  ;;  %v210_v11 = vmul.f32 %v765_v6, %v765_v6  ;;  %v186_v12 = vld [vmem:[%s743_s15 + $0x20] sm:$0xff]  ;;  %v199_v13 = vadd.f32 %v771_v8, %v768_v7  ;;  %v209_v14 = vmul.f32 %v768_v7, %v768_v7  ;;  %v187_v16 = vld [vmem:[%s743_s15 + $0x28] sm:$0xff]  ;;  %v188_v20 = vld [vmem:[%s743_s15 + $0x30] sm:$0xff]  ;;  %p520_p8 = scmp.ne.s32.totalorder %s796_s25, %s519_s7  ;;  %p860_p9 = scmp.ne.s32.totalorder %s856_s22, 0 }
  0x3e   : > { %v211_v15 = vmul.f32 %v771_v8, %v771_v8  ;;  %v212_v18 = vmul.f32 %v186_v12, %v186_v12  ;;  %v213_v22 = vmul.f32 %v187_v16, %v187_v16  ;;  %v189_v24 = vld [vmem:[%s743_s15 + $0x38] sm:$0xff]  ;;  %v214_v26 = vmul.f32 %v188_v20, %v188_v20  ;;  %s607_s8 = smov [#allocation5]  }
  0x3f   : > { %v191_v17 = vadd.f32 %v190_v9, %v186_v12  ;;  %v216_v19 = vadd.f32 %v210_v11, %v208_v10  ;;  %v200_v21 = vadd.f32 %v199_v13, %v187_v16  ;;  %v215_v29 = vmul.f32 %v189_v24, %v189_v24  ;;  %p521_p11 = pnand %p520_p8, %p860_p9  ;;  %s523_s15 = sshll.u32 %s607_s8, 4  ;;  %s524_s15 = int_to_ptr.vmem [resolvable:$false] %s523_s15 }
  0x40   : > { %277 = vperm.xlu1 %484, %v251_v3   ;;  %267 = vperm.xlu0 %483, %v249_v4   ;;  %v225_v23 = vadd.f32 %v211_v15, %v209_v14  ;;  %s525_s30 = scalar_lea.vmem %s524_s15, 2048  ;;  %p526_p6 = scmp.lt.s32.totalorder %s796_s25, %s524_s15 }
  0x41   : > { %v192_v25 = vadd.f32 %v191_v17, %v188_v20  ;;  %v217_v27 = vadd.f32 %v216_v19, %v212_v18  ;;  %v201_v28 = vadd.f32 %v200_v21, %v189_v24  ;;  %p522_p0 = pneg %p521_p11  ;;  %p527_p13 = scmp.lt.s32.totalorder %s525_s30, %s519_s7 }
  0x42   : > { %v226_v30 = vadd.f32 %v225_v23, %v213_v22 }
  0x43   : > { %v193_v31 = vrot.slane %v192_v25, 4  ;;  %v218_v32 = vadd.f32 %v217_v27, %v214_v26  ;;  %v202_v33 = vrot.slane %v201_v28, 4  ;;  %p528_p2 = por %p527_p13, %p526_p6 }
  0x44   : > { %v227_v34 = vadd.f32 %v226_v30, %v215_v29 }
  0x45   : > { %v194_v35 = vadd.f32 %v193_v31, %v192_v25  ;;  %v219_v36 = vrot.slane %v218_v32, 4  ;;  %v203_v37 = vadd.f32 %v202_v33, %v201_v28  ;;  %p529_p5 = pnand %p528_p2, %p522_p0 }
  0x46   : > { %v228_v38 = vrot.slane %v227_v34, 4 }
  0x47   : > { %v195_v39 = vrot.slane %v194_v35, 2  ;;  %v220_v40 = vadd.f32 %v219_v36, %v218_v32  ;;  %v204_v41 = vrot.slane %v203_v37, 2 }
  0x48   : > { %v229_v42 = vadd.f32 %v228_v38, %v227_v34 }
  0x49   : > { %v196_v43 = vadd.f32 %v195_v39, %v194_v35  ;;  %v221_v44 = vrot.slane %v220_v40, 2  ;;  %v205_v45 = vadd.f32 %v204_v41, %v203_v37 }
  0x4a   : > { %v230_v46 = vrot.slane %v229_v42, 2 }
  0x4b   : > { %v197_v47 = vrot.slane %v196_v43, 1  ;;  %v222_v48 = vadd.f32 %v221_v44, %v220_v40  ;;  %v206_v49 = vrot.slane %v205_v45, 1 }
  0x4c   : > { %v231_v50 = vadd.f32 %v230_v46, %v229_v42 }
  0x4d   : > { %v198_v51 = vadd.f32 %v197_v47, %v196_v43  ;;  %v223_v52 = vrot.slane %v222_v48, 1  ;;  %v207_v53 = vadd.f32 %v206_v49, %v205_v45 }
  0x4e   : > { %v232_v54 = vrot.slane %v231_v50, 1 }
  0x4f   : > { %v224_v55 = vadd.f32 %v223_v52, %v222_v48  ;;  %v234_v56 = vmul.f32 0.03125, %v198_v51  ;;  %v235_v58 = vmul.f32 0.03125, %v207_v53 }
  0x50   : > { %v233_v57 = vadd.f32 %v232_v54, %v231_v50 }
  0x51   : > { %v236_v59 = vmul.f32 0.03125, %v224_v55  ;;  %v238_v60 = vmul.f32 %v234_v56, %v234_v56  ;;  %v239_v62 = vmul.f32 %v235_v58, %v235_v58 }
  0x52   : > { %v237_v61 = vmul.f32 0.03125, %v233_v57 }
  0x53   : > { %v240_v63 = vsub.f32 %v236_v59, %v238_v60 }
  0x54   : > { %v241_v0 = vsub.f32 %v237_v61, %v239_v62 }
  0x55   : > { %v242_v1 = vmax.f32 %v240_v63, 0.0 }
  0x56   : > { %v243_v2 = vmax.f32 %v241_v0, 0.0 }
  0x57   : > { %v244_v3 = vadd.f32 1e-05, %v242_v1 }
  0x58   : > { %v245_v4 = vadd.f32 1e-05, %v243_v2 }
  0x59   : > { %485 = vrsqrt.f32 %v244_v3 }
  0x5a   : > { %487 = vrsqrt.f32 %v245_v4 }
  0x63   : > { %v486_v9 = vpop.eup %485 }
  0x64   : > { %v488_v10 = vpop.eup %487  ;;  %v256_v11 = vmul.f32 %v486_v9, %v186_v12  ;;  %v252_v14 = vmul.f32 %v486_v9, %v762_v5  ;;  %v258_v19 = vmul.f32 %v486_v9, %v188_v20  ;;  %v254_v22 = vmul.f32 %v486_v9, %v765_v6 }
  0x65   : > { %v257_v13 = vmul.f32 %v488_v10, %v187_v16  ;;  %v253_v15 = vmul.f32 %v488_v10, %v768_v7  ;;  %v259_v21 = vmul.f32 %v488_v10, %v189_v24  ;;  %v255_v23 = vmul.f32 %v488_v10, %v771_v8 }
  0xbb   : > { %v273_v17 = vpop.permute.xlu1 %272  ;;  %v263_v18 = vpop.permute.xlu0 %262 }
  0xbc   : > { %v284_v25 = vmul.f32 %v273_v17, %v256_v11  ;;  %v285_v26 = vmul.f32 %v273_v17, %v257_v13  ;;  %v280_v12 = vmul.f32 %v263_v18, %v252_v14  ;;  %v281_v27 = vmul.f32 %v263_v18, %v253_v15 }
  0xbe   : > { %292 = vst [vmem:[%s179_s20 + $0x20] sm:$0xff] %v284_v25  ;;  %293 = vst [vmem:[%s179_s20 + $0x28] sm:$0xff] %v285_v26 }
  0xbf   : > { %288 = vst [vmem:[%s179_s20] sm:$0xff] %v280_v12  ;;  %289 = vst [vmem:[%s179_s20 + $0x8] sm:$0xff] %v281_v27  ;;  %v278_v5 = vpop.permute.xlu1 %277  ;;  %v268_v7 = vpop.permute.xlu0 %267 }
  0xc0   : > { %v286_v6 = vmul.f32 %v278_v5, %v258_v19  ;;  %v287_v8 = vmul.f32 %v278_v5, %v259_v21  ;;  %v282_v16 = vmul.f32 %v268_v7, %v254_v22  ;;  %v283_v20 = vmul.f32 %v268_v7, %v255_v23 }
  0xc2   : > { %294 = vst [vmem:[%s179_s20 + $0x30] sm:$0xff] %v286_v6  ;;  %295 = vst [vmem:[%s179_s20 + $0x38] sm:$0xff] %v287_v8 }
  0xc3   : > { %290 = vst [vmem:[%s179_s20 + $0x10] sm:$0xff] %v282_v16  ;;  %291 = vst [vmem:[%s179_s20 + $0x18] sm:$0xff] %v283_v20 }
  0xc4   : > { %532 = shalt.err (!%p529_p5)
}
  0xc5   : > { %s533_s4 = scalar_lea.hbm %s801_s29, 1024  ;;  %s537_s21 = scalar_lea.hbm %s852_s2, 2048 }
  0xc6   : > { %p534_p4 = scmp.ne.s32.totalorder %s801_s29, %s533_s4  ;;  %p538_p12 = scmp.lt.u32.totalorder %s801_s29, %s852_s2 }
  0xc7   : > { %p539_p1 = scmp.lt.u32.totalorder %s537_s21, %s533_s4  ;;  %p541_p8 = scmp.lt.u32.totalorder %s533_s4, %s801_s29 }
  0xc8   : > { %p535_p7 = pnand %p534_p4, %p860_p9 }
  0xc9   : > { %p540_p3 = por %p539_p1, %p538_p12 }
  0xca   : > { %p536_p10 = pneg %p535_p7 }
  0xcb   : > { %p542_p11 = por %p541_p8, %p540_p3 }
  0xcd   : > { %p543_p0 = pnand %p542_p11, %p536_p10 }
  0xcf   : > { %546 = shalt.err (!%p543_p0)
}
  0xd0   : > { %s608_s19 = smov 256   ;;  %s609_s20 = smov 16  }
  0xd1   : > { %418 = dma.vmem_to_hbm [thread:$0]  (%p860_p9), %s796_s25, 1024, %s801_s29, %s297_s12, %s608_s19, %s608_s19, %s609_s20  }
  0xd2 PF: > { %s327_s26 = sand.u32 1, %s581_s9   ;;  %p861_p6 = scmp.ne.s32.totalorder %s857_s24, 0 }
  0xd3   : > { %p862_p13 = scmp.ge.s32.totalorder %s601_s14, 2  ;;  %s328_s27 = scalar_lea.sflag [#allocation4], %s327_s26 }
  0xd5   : > { %p425_p2 = pnand %p862_p13, %p861_p6 }
  0xd7   : > { %576 = dma.done.wait (!%p425_p2), %s328_s27, 1024  }
  0xd8   : > { %578 = vsyncadd (!%p425_p2), %s328_s27, 4294966272  ;;  %s18_s14 = sadd.s32 1, %s601_s14   ;;  %s863_s9 = smov %s585_s10 }
  0xd9   : > { %p15_p5 = scmp.ge.s32.totalorder %s18_s14, 4   ;;  %s864_s10 = smov %s589_s11 }
  0xda   : > { %s865_s11 = smov %s681_s23  ;;  %s866_s12 = smov %s597_s13 }
  0xdb   : > { %s867_s13 = smov %s869_s17  ;;  %17 = sbr.rel (!%p15_p5) target bundleno = 6 (0x6), region = 73 }
  0xe2   :  { %333 = vsyncpa [#allocation3], 1 }
  0xe3   :  { %335 = vsyncpa [#allocation3 + $0x1], 1 }
  0xe4   :  { %336 = vsyncpa [#allocation4], 1 }
  0xe5   :  { %338 = vsyncpa [#allocation4 + $0x1], 1 }

</bundles_post_ra>
